<compile_context>
chip_gen: v6e
topology: v6e:2x2x1
jax: 0.10.0
libtpu: 0.0.40
codegen_flags: <defaults>
</compile_context>

<pallas_src>
import functools

import jax
import jax.numpy as jnp
from jax.experimental import pallas as pl
from jax.experimental.pallas import tpu as pltpu

# ----------------------------- model config ---------------------------------
COLOR_DIM = 3
SIZE_DIM = 1
SHAPE_DIM = 4
TOTAL_DIM = COLOR_DIM + SIZE_DIM + SHAPE_DIM          # 8
PAIR_DIM = 2 * TOTAL_DIM                              # 16
HIDDEN_DIM = 128
CONTEXT_DIM = 128

MIN_TILE = 512
MAX_TILE = 4096
_HIGH = jax.lax.Precision.HIGHEST


def _round_up(x, m):
    return ((x + m - 1) // m) * m


# ------------------------- kernel: batched pair scoring ----------------------
def _pair_kernel(idx_i_ref,   # [1, T] int32  pair "i" indices (blocked)
                 idx_j_ref,   # [1, T] int32  pair "j" indices (blocked)
                 ai_ref,      # [H, N] f32    w3_i^T @ feats^T   (resident)
                 aj_ref,      # [H, N] f32    w3_j^T @ feats^T   (resident)
                 ctx_ref,     # [H, 1] f32    context@w3_c + b3  (resident)
                 w4_ref,      # [1, H] f32    pair_encoder.2 weight (resident)
                 b4_ref,      # [1]    f32    pair_encoder.2 bias (SMEM scalar)
                 out_ref):    # [1, T] f32    lane-dense scores
    f32 = jnp.float32
    n = ai_ref.shape[1]
    t = idx_i_ref.shape[1]

    # In-kernel gather: one-hot selection matrices ride the MXU (K = N).
    obj_ids = jax.lax.broadcasted_iota(jnp.int32, (n, t), 0)
    oh_i = (obj_ids == idx_i_ref[...]).astype(f32)                    # [N, T]
    oh_j = (obj_ids == idx_j_ref[...]).astype(f32)                    # [N, T]

    # pair Linear: per-object columns + precomputed context contribution (+b3).
    z = (jnp.dot(ai_ref[...], oh_i, preferred_element_type=f32)
         + jnp.dot(aj_ref[...], oh_j, preferred_element_type=f32)
         + ctx_ref[...])                                              # [H, T]
    h2 = jnp.maximum(z, 0.0)

    logit = jnp.dot(w4_ref[...], h2, preferred_element_type=f32) + b4_ref[0]
    out_ref[...] = jax.nn.sigmoid(logit)                              # [1, T]


# ------------------------------- jitted impl ---------------------------------
@functools.partial(jax.jit, static_argnames=("tile_p", "p_pad"))
def _scores_impl(feats, idx_i, idx_j, kp, *, tile_p, p_pad):
    f32 = jnp.float32
    n = feats.shape[0]
    p = idx_i.shape[0]

    # --- O(1)/O(N) prep, run once per call and fused by XLA (review: drop the
    # --- standalone context pallas_call + its launch/weight-DMA overhead).
    mean_feat = jnp.mean(feats, axis=0)                                   # [8]
    h1 = jnp.maximum(jnp.dot(mean_feat, kp["w1"], precision=_HIGH) + kp["b1"], 0.0)
    context = jnp.dot(h1, kp["w2"], precision=_HIGH) + kp["b2"]           # [128]
    ctx_col = (jnp.dot(context, kp["w3c"], precision=_HIGH) + kp["b3"])[:, None]
    ai = jnp.dot(feats, kp["w3i"], precision=_HIGH).T                     # [128, N]
    aj = jnp.dot(feats, kp["w3j"], precision=_HIGH).T                     # [128, N]

    idx_i_row = jnp.pad(idx_i, (0, p_pad - p)).reshape(1, p_pad)
    idx_j_row = jnp.pad(idx_j, (0, p_pad - p)).reshape(1, p_pad)

    const2d = lambda t: (0, 0)
    scores = pl.pallas_call(
        _pair_kernel,
        out_shape=jax.ShapeDtypeStruct((1, p_pad), f32),
        grid=(p_pad // tile_p,),
        in_specs=[
            pl.BlockSpec((1, tile_p), lambda t: (0, t)),          # idx_i tile
            pl.BlockSpec((1, tile_p), lambda t: (0, t)),          # idx_j tile
            pl.BlockSpec((HIDDEN_DIM, n), const2d),               # Ai (resident)
            pl.BlockSpec((HIDDEN_DIM, n), const2d),               # Aj (resident)
            pl.BlockSpec((HIDDEN_DIM, 1), const2d),               # ctx column
            pl.BlockSpec((1, HIDDEN_DIM), const2d),               # w4 row
            pl.BlockSpec(memory_space=pltpu.MemorySpace.SMEM),    # b4 scalar
        ],
        out_specs=pl.BlockSpec((1, tile_p), lambda t: (0, t)),
        compiler_params=pltpu.CompilerParams(
            dimension_semantics=("parallel",),        # shard tiles on v7x TCs
            vmem_limit_bytes=32 * 1024 * 1024,        # keep 2-deep buffering
        ),
    )(idx_i_row, idx_j_row, ai, aj, ctx_col, kp["w4r"], kp["b4"])

    return scores[0, :p]


# --------------------------------- wrappers -----------------------------------
def contextual_similarity_scores(feats, idx_i, idx_j, kparams, *, max_tile=MAX_TILE):
    """feats: [N, 8] f32; idx_i/idx_j: int [P]. Returns [P] similarity scores."""
    p = int(idx_i.shape[0])
    # Bucket P to a power of two (min 512) -> hot compile cache across calls.
    p_bucket = max(MIN_TILE, 1 << (max(p, 1) - 1).bit_length())
    # Aim for >= 2 tiles when possible (v7x has 2 TensorCores), cap tile size.
    tile_p = min(max_tile, max(MIN_TILE, _round_up(p_bucket // 2, MIN_TILE)))
    p_pad = _round_up(p_bucket, tile_p)
    return _scores_impl(feats,
                        jnp.asarray(idx_i, jnp.int32),
                        jnp.asarray(idx_j, jnp.int32),
                        kparams, tile_p=tile_p, p_pad=p_pad)


def contextual_similarity_score(objects, i, j, kparams):
    """Original single-(i, j) API of the PyTorch module."""
    feats = jnp.stack([encode(o) for o in objects])
    idx_i = jnp.array([i], jnp.int32)
    idx_j = jnp.array([j], jnp.int32)
    return contextual_similarity_scores(feats, idx_i, idx_j, kparams)[0]


# -------------------------- parameter construction ---------------------------
def _linear_params(key, fan_in, fan_out):
    """PyTorch-style uniform init; weight stored as [in, out], bias as [out]."""
    kw, kb = jax.random.split(key)
    bound = 1.0 / jnp.sqrt(jnp.float32(fan_in))
    w = jax.random.uniform(kw, (fan_in, fan_out), jnp.float32, -bound, bound)
    b = jax.random.uniform(kb, (fan_out,), jnp.float32, -bound, bound)
    return w, b


def init_params(key):
    k1, k2, k3, k4 = jax.random.split(key, 4)
    w1, b1 = _linear_params(k1, TOTAL_DIM, HIDDEN_DIM)               # context_encoder.0
    w2, b2 = _linear_params(k2, HIDDEN_DIM, CONTEXT_DIM)             # context_encoder.2
    w3, b3 = _linear_params(k3, PAIR_DIM + CONTEXT_DIM, HIDDEN_DIM)  # pair_encoder.0
    w4, b4 = _linear_params(k4, HIDDEN_DIM, 1)                       # pair_encoder.2
    return dict(w1=w1, b1=b1, w2=w2, b2=b2, w3=w3, b3=b3, w4=w4, b4=b4)


def pack_params(p):
    """Re-layout parameters for the kernel (slicing / transposition only)."""
    return {
        "w1": p["w1"], "b1": p["b1"],
        "w2": p["w2"], "b2": p["b2"],
        "w3i": p["w3"][:TOTAL_DIM],                 # [8, 128]   (feat_i rows)
        "w3j": p["w3"][TOTAL_DIM:PAIR_DIM],         # [8, 128]   (feat_j rows)
        "w3c": p["w3"][PAIR_DIM:],                  # [128, 128] (context rows)
        "b3": p["b3"],
        "w4r": p["w4"].T,                           # [1, 128]
        "b4": p["b4"],                              # [1]  -> SMEM scalar
    }


def encode(obj):
    """torch.cat([o['color'], o['size'], o['shape']], dim=-1) equivalent."""
    return jnp.concatenate([obj["color"], obj["size"], obj["shape"]], axis=-1)


# ------------------------------ reference ------------------------------------
def reference_scores(feats, idx_i, idx_j, p):
    mean_feat = feats.mean(axis=0)
    h1 = jnp.maximum(mean_feat @ p["w1"] + p["b1"], 0.0)
    context = h1 @ p["w2"] + p["b2"]
    pair = jnp.concatenate(
        [feats[idx_i], feats[idx_j],
         jnp.broadcast_to(context, (idx_i.shape[0], CONTEXT_DIM))], axis=-1)
    h2 = jnp.maximum(pair @ p["w3"] + p["b3"], 0.0)
    return jax.nn.sigmoid(h2 @ p["w4"] + p["b4"])[:, 0]


# --------------------------------- main ---------------------------------------
if __name__ == "__main__":
    key = jax.random.PRNGKey(0)
    pkey, dkey = jax.random.split(key)
    params = init_params(pkey)
    kparams = pack_params(params)

    # Small synthetic scene: list of object dicts, exactly like the module spec.
    num_objects = 24
    objects = []
    for _ in range(num_objects):
        kc, ks, kh, dkey = jax.random.split(dkey, 4)
        objects.append({
            "color": jax.random.normal(kc, (COLOR_DIM,), jnp.float32),
            "size":  jax.random.normal(ks, (SIZE_DIM,), jnp.float32),
            "shape": jax.random.normal(kh, (SHAPE_DIM,), jnp.float32),
        })

    feats = jnp.stack([encode(o) for o in objects])                  # [24, 8]

    # Score every ordered pair (i, j) in one batched, gridded call.
    ii, jj = jnp.meshgrid(jnp.arange(num_objects), jnp.arange(num_objects),
                          indexing="ij")
    idx_i = ii.reshape(-1).astype(jnp.int32)                         # [576]
    idx_j = jj.reshape(-1).astype(jnp.int32)

    scores = contextual_similarity_scores(feats, idx_i, idx_j, kparams)
    scores = jax.block_until_ready(scores)

    ref = reference_scores(feats, idx_i, idx_j, params)
    assert scores.shape == (num_objects * num_objects,)
    assert jnp.allclose(scores, ref, atol=1e-5, rtol=1e-5), (
        float(jnp.max(jnp.abs(scores - ref))))
    assert bool(jnp.all((scores >= 0.0) & (scores <= 1.0)))

    # Original single-pair API (i=1, j=3) still works and matches.
    single = contextual_similarity_score(objects, 1, 3, kparams)
    single = jax.block_until_ready(single)
    assert jnp.allclose(single, ref[1 * num_objects + 3], atol=1e-5, rtol=1e-5)

    print("KERNEL_OK")
</pallas_src>

<mosaic_0001>
module attributes {stable_mosaic.version = 11 : i64} {
  func.func @_pair_kernel(%arg0: i32, %arg1: memref<1x512xi32, #tpu.memory_space<vmem>>, %arg2: memref<1x512xi32, #tpu.memory_space<vmem>>, %arg3: memref<128x24xf32, #tpu.memory_space<vmem>>, %arg4: memref<128x24xf32, #tpu.memory_space<vmem>>, %arg5: memref<128x1xf32, #tpu.memory_space<vmem>>, %arg6: memref<1x128xf32, #tpu.memory_space<vmem>>, %arg7: memref<1xf32, #tpu.memory_space<smem>>, %arg8: memref<1x512xf32, #tpu.memory_space<vmem>>) attributes {dimension_semantics = [#tpu.dimension_semantics<parallel>], iteration_bounds = array<i64: 2>, scalar_prefetch = 0 : i64, scratch_operands = 0 : i64, tpu.core_type = #tpu.core_type<tc>, window_params = [{transform_indices = @transform_0, window_bounds = array<i64: 1, 512>}, {transform_indices = @transform_1, window_bounds = array<i64: 1, 512>}, {pipeline_mode = #tpu.pipeline_mode<synchronous>, transform_indices = @transform_2, window_bounds = array<i64: 128, 24>}, {pipeline_mode = #tpu.pipeline_mode<synchronous>, transform_indices = @transform_3, window_bounds = array<i64: 128, 24>}, {pipeline_mode = #tpu.pipeline_mode<synchronous>, transform_indices = @transform_4, window_bounds = array<i64: 128, 1>}, {pipeline_mode = #tpu.pipeline_mode<synchronous>, transform_indices = @transform_5, window_bounds = array<i64: 1, 128>}, {transform_indices = @transform_6, window_bounds = array<i64: 1>}, {transform_indices = @transform_7, window_bounds = array<i64: 1, 512>}]} {
    %0 = tpu.iota {dimensions = array<i32: 0>} : vector<24x512xi32>
    %c0 = arith.constant 0 : index
    %c0_0 = arith.constant 0 : index
    %1 = vector.load %arg1[%c0, %c0_0] : memref<1x512xi32, #tpu.memory_space<vmem>>, vector<1x512xi32>
    %2 = vector.broadcast %1 : vector<1x512xi32> to vector<24x512xi32>
    %3 = arith.cmpi eq, %0, %2 : vector<24x512xi32>
    %4 = arith.extui %3 : vector<24x512xi1> to vector<24x512xi32>
    %5 = arith.sitofp %4 : vector<24x512xi32> to vector<24x512xf32>
    %c0_1 = arith.constant 0 : index
    %c0_2 = arith.constant 0 : index
    %6 = vector.load %arg2[%c0_1, %c0_2] : memref<1x512xi32, #tpu.memory_space<vmem>>, vector<1x512xi32>
    %7 = vector.broadcast %6 : vector<1x512xi32> to vector<24x512xi32>
    %8 = arith.cmpi eq, %0, %7 : vector<24x512xi32>
    %9 = arith.extui %8 : vector<24x512xi1> to vector<24x512xi32>
    %10 = arith.sitofp %9 : vector<24x512xi32> to vector<24x512xf32>
    %c0_3 = arith.constant 0 : index
    %c0_4 = arith.constant 0 : index
    %11 = vector.load %arg3[%c0_3, %c0_4] : memref<128x24xf32, #tpu.memory_space<vmem>>, vector<128x24xf32>
    %cst = arith.constant dense<0.000000e+00> : vector<128x512xf32>
    %12 = tpu.matmul %11, %5, %cst {dimension_numbers = #tpu.dot_dimension_numbers<[1], [0], [0], [1], [0, 0, 1, 1], [], []>} : vector<128x24xf32>, vector<24x512xf32>, vector<128x512xf32> -> vector<128x512xf32>
    %c0_5 = arith.constant 0 : index
    %c0_6 = arith.constant 0 : index
    %13 = vector.load %arg4[%c0_5, %c0_6] : memref<128x24xf32, #tpu.memory_space<vmem>>, vector<128x24xf32>
    %cst_7 = arith.constant dense<0.000000e+00> : vector<128x512xf32>
    %14 = tpu.matmul %13, %10, %cst_7 {dimension_numbers = #tpu.dot_dimension_numbers<[1], [0], [0], [1], [0, 0, 1, 1], [], []>} : vector<128x24xf32>, vector<24x512xf32>, vector<128x512xf32> -> vector<128x512xf32>
    %15 = arith.addf %12, %14 : vector<128x512xf32>
    %c0_8 = arith.constant 0 : index
    %c0_9 = arith.constant 0 : index
    %16 = vector.load %arg5[%c0_8, %c0_9] : memref<128x1xf32, #tpu.memory_space<vmem>>, vector<128x1xf32>
    %17 = vector.broadcast %16 : vector<128x1xf32> to vector<128x512xf32>
    %18 = arith.addf %15, %17 : vector<128x512xf32>
    %cst_10 = arith.constant 0.000000e+00 : f32
    %19 = vector.broadcast %cst_10 : f32 to vector<128x512xf32>
    %20 = arith.maximumf %18, %19 : vector<128x512xf32>
    %c0_11 = arith.constant 0 : index
    %c0_12 = arith.constant 0 : index
    %21 = vector.load %arg6[%c0_11, %c0_12] : memref<1x128xf32, #tpu.memory_space<vmem>>, vector<1x128xf32>
    %cst_13 = arith.constant dense<0.000000e+00> : vector<1x512xf32>
    %22 = tpu.matmul %21, %20, %cst_13 {dimension_numbers = #tpu.dot_dimension_numbers<[1], [0], [0], [1], [0, 0, 1, 1], [], []>} : vector<1x128xf32>, vector<128x512xf32>, vector<1x512xf32> -> vector<1x512xf32>
    %c0_14 = arith.constant 0 : index
    %23 = memref.load %arg7[%c0_14] : memref<1xf32, #tpu.memory_space<smem>>
    %24 = vector.broadcast %23 : f32 to vector<1x512xf32>
    %25 = arith.addf %22, %24 : vector<1x512xf32>
    %26 = arith.negf %25 : vector<1x512xf32>
    %27 = math.exp %26 : vector<1x512xf32>
    %cst_15 = arith.constant 1.000000e+00 : f32
    %28 = vector.broadcast %cst_15 : f32 to vector<1x512xf32>
    %29 = arith.addf %28, %27 : vector<1x512xf32>
    %30 = arith.divf %28, %29 : vector<1x512xf32>
    %c0_16 = arith.constant 0 : index
    %c0_17 = arith.constant 0 : index
    %31 = vector.load %arg8[%c0_16, %c0_17] : memref<1x512xf32, #tpu.memory_space<vmem>>, vector<1x512xf32>
    tpu.vector_store %arg8[%c0_16, %c0_17], %30 {strides = array<i32>} : memref<1x512xf32, #tpu.memory_space<vmem>>, vector<1x512xf32>,
    return
  }
  func.func @transform_0(%arg0: i32) -> (i32, i32) {
    %c0_i32 = arith.constant 0 : i32
    %c0_i32_0 = arith.constant 0 : i32
    return %c0_i32, %arg0 : i32, i32
  }
  func.func @transform_1(%arg0: i32) -> (i32, i32) {
    %c0_i32 = arith.constant 0 : i32
    %c0_i32_0 = arith.constant 0 : i32
    return %c0_i32, %arg0 : i32, i32
  }
  func.func @transform_2(%arg0: i32) -> (i32, i32) {
    %c0_i32 = arith.constant 0 : i32
    %c0_i32_0 = arith.constant 0 : i32
    %c0_i32_1 = arith.constant 0 : i32
    return %c0_i32, %c0_i32_0 : i32, i32
  }
  func.func @transform_3(%arg0: i32) -> (i32, i32) {
    %c0_i32 = arith.constant 0 : i32
    %c0_i32_0 = arith.constant 0 : i32
    %c0_i32_1 = arith.constant 0 : i32
    return %c0_i32, %c0_i32_0 : i32, i32
  }
  func.func @transform_4(%arg0: i32) -> (i32, i32) {
    %c0_i32 = arith.constant 0 : i32
    %c0_i32_0 = arith.constant 0 : i32
    %c0_i32_1 = arith.constant 0 : i32
    return %c0_i32, %c0_i32_0 : i32, i32
  }
  func.func @transform_5(%arg0: i32) -> (i32, i32) {
    %c0_i32 = arith.constant 0 : i32
    %c0_i32_0 = arith.constant 0 : i32
    %c0_i32_1 = arith.constant 0 : i32
    return %c0_i32, %c0_i32_0 : i32, i32
  }
  func.func @transform_6(%arg0: i32) -> i32 {
    %c0_i32 = arith.constant 0 : i32
    %c0_i32_0 = arith.constant 0 : i32
    return %c0_i32 : i32
  }
  func.func @transform_7(%arg0: i32) -> (i32, i32) {
    %c0_i32 = arith.constant 0 : i32
    %c0_i32_0 = arith.constant 0 : i32
    return %c0_i32, %arg0 : i32, i32
  }
}

</mosaic_0001>

<bundles_post_ra>
// kernel: _scores_impl.1
= control target key start
LH: loop header
LB: loop body
LE: loop exit
PB: predicated region body
PF: predicated region fallthrough
CT: control target
= control target key end

     0   :  { %s1874_s26 = smov 0   ;;  %s2598_s0 = inlined_call_operand.vmem [shape: s32[1,1024], index: 0, kind: input, shape index: {}]   ;;  %s2599_s1 = inlined_call_operand.vmem [shape: s32[1,1024], index: 1, kind: input, shape index: {}]   ;;  %s2600_s2 = inlined_call_operand.vmem [shape: f32[128,24], index: 2, kind: input, shape index: {}]   ;;  %s2601_s3 = inlined_call_operand.vmem [shape: f32[128,24], index: 3, kind: input, shape index: {}]   ;;  %s2602_s4 = inlined_call_operand.vmem [shape: f32[128,1], index: 4, kind: input, shape index: {}]   ;;  %s2603_s5 = inlined_call_operand.vmem [shape: f32[1,128], index: 5, kind: input, shape index: {}]   ;;  %s2604_s6 = inlined_call_operand.<no memory space> [shape: f32[1], index: 6, kind: input, shape index: {}]   ;;  %s2605_s7 = inlined_call_operand.vmem [shape: f32[1,1024], index: 7, kind: output, shape index: {}]  }
   0x1   :  { %12 = sst [smem:[#allocation2]] %s2604_s6 }
   0x2 LB: > { %s1663_s27 = sadd.s32 4294967295, %s1825_s26   ;;  %p1667_p0 = scmp.ge.s32.totalorder %s1825_s26, 1  ;;  %s1825_s26 = sphi %s1874_s26, %s18_s26  }
   0x3   : > { %p248_p1 = scmp.lt.s32.totalorder %s1825_s26, 3 }
   0x5   : > { %p249_p2 = pnand %p1667_p0, %p248_p1 }
   0x7   : > { %252 = sbr.rel (%p249_p2) target bundleno = 623 (0x26f), region = 48 }
   0xc   : > { %s1668_s28 = sshll.u32 %s1663_s27, 2  ;;  %v2606_v0 = vlaneseq  ;;  %v1827_v1 = vmov 0.0   ;;  %v1828_v3 = vmov 0   ;;  %v1829_v19 = vmov 1.0   ;;  %v423_v21 = vld [vmem:[%s2601_s3] sm:$0xff]  ;;  %v424_v22 = vld [vmem:[%s2601_s3 + $0x8] sm:$0xff] }
   0xd   : > { %p283_p3 = scmp.lt.s32.totalorder %s1668_s28, 7  ;;  %552 = vmatprep.mubr.f32.mxu0 %v1827_v1  ;;  %713 = vmatprep.mubr.f32.mxu1 %v1827_v1  ;;  %vm439_vm12 = vcmask 195584   ;;  %v425_v23 = vld [vmem:[%s2601_s3 + $0x10] sm:$0xff]  ;;  %v426_v24 = vld [vmem:[%s2601_s3 + $0x18] sm:$0xff]  ;;  %v1193_v25 = vld [vmem:[%s2602_s4 + $0x68] sm:$0xff]  ;;  %s1405_s21 = sld [smem:[#allocation2]] }
   0xe   : > { %v1885_v2 = vshrl.u32 %v2606_v0, 7  ;;  %1802 = vset.pattern.permute.xlu1 %v1828_v3  ;;  %1801 = vset.pattern.permute.xlu0 %v1828_v3  ;;  %v1195_v26 = vld [vmem:[%s2602_s4 + $0x78] sm:$0xff]  ;;  %v427_v27 = vld [vmem:[%s2601_s3 + $0x20] sm:$0xff]  ;;  %v1194_v29 = vld [vmem:[%s2602_s4 + $0x70] sm:$0xff] }
   0xf   : > { %s2707_s28 = smov (!%p283_p3, %s1668_s28), 7  ;;  %1263 = vperm.xlu1 %1802, %v1193_v25   ;;  %1273 = vperm.xlu0 %1801, %v1195_v26   ;;  %v1192_v28 = vld [vmem:[%s2602_s4 + $0x60] sm:$0xff]  ;;  %v428_v30 = vld [vmem:[%s2601_s3 + $0x28] sm:$0xff]  ;;  %v1190_v31 = vld [vmem:[%s2602_s4 + $0x50] sm:$0xff] }
  0x10   : > { %2611 = vst [vmem:[#allocation3_spill] sm:$0xff] %v1885_v2  ;;  %v308_v4 = vsub.s32 1, %v1885_v2  ;;  %v316_v5 = vsub.s32 3, %v1885_v2  ;;  %v304_v6 = vsub.s32 0, %v1885_v2  ;;  %s290_s30 = scalar_lea.vmem %s2599_s1, %s2707_s28  ;;  %v300_v7 = vadd.s32 16, %v1885_v2  ;;  %s285_s10 = scalar_lea.vmem %s2598_s0, %s2707_s28  ;;  %v1191_v32 = vld [vmem:[%s2602_s4 + $0x58] sm:$0xff] }
  0x11   : > { %v312_v8 = vsub.s32 2, %v1885_v2  ;;  %v354_v9 = vld [vmem:[%s290_s30] sm:$0xf]  ;;  %v1899_v10 = vadd.s32 8, %v1885_v2  ;;  %v429_v33 = vld [vmem:[%s2601_s3 + $0x30] sm:$0xff]  ;;  %v1189_v35 = vld [vmem:[%s2602_s4 + $0x48] sm:$0xff]  ;;  %s295_s24 = scalar_lea.vmem %s2605_s7, %s2707_s28 }
  0x12   : > { %v362_v11 = vrot.slane %v354_v9, %v308_v4  ;;  %v370_v12 = vrot.slane %v354_v9, %v316_v5  ;;  %v358_v13 = vrot.slane %v354_v9, %v304_v6  ;;  %v301_v15 = vld [vmem:[%s285_s10] sm:$0xf]  ;;  %v430_v36 = vld [vmem:[%s2601_s3 + $0x38] sm:$0xff]  ;;  %v1186_v37 = vld [vmem:[%s2602_s4 + $0x30] sm:$0xff] }
  0x13   : > { %v366_v14 = vrot.slane %v354_v9, %v312_v8  ;;  %v1905_v16 = vrot.slane %v301_v15, %v308_v4  ;;  %v1907_v17 = vrot.slane %v301_v15, %v316_v5  ;;  %v1909_v18 = vrot.slane %v301_v15, %v304_v6  ;;  %1258 = vperm.xlu1 %1802, %v1192_v28   ;;  %v1188_v34 = vld [vmem:[%s2602_s4 + $0x40] sm:$0xff]  ;;  %v1187_v38 = vld [vmem:[%s2602_s4 + $0x38] sm:$0xff]  ;;  %v1185_v41 = vld [vmem:[%s2602_s4 + $0x28] sm:$0xff] }
  0x14   : > { %vm380_vm0 = vcmp.eq.s32.totalorder %v300_v7, %v362_v11  ;;  %vm382_vm1 = vcmp.eq.s32.totalorder %v300_v7, %v370_v12  ;;  %vm379_vm2 = vcmp.eq.s32.totalorder %v300_v7, %v358_v13  ;;  %vm376_vm4 = vcmp.eq.s32.totalorder %v1899_v10, %v362_v11  ;;  %1268 = vperm.xlu0 %1801, %v1194_v29   ;;  %v431_v39 = vld [vmem:[%s2601_s3 + $0x40] sm:$0xff]  ;;  %v432_v42 = vld [vmem:[%s2601_s3 + $0x48] sm:$0xff]  ;;  %v1182_v43 = vld [vmem:[%s2602_s4 + $0x10] sm:$0xff] }
  0x15   : > { %vm381_vm3 = vcmp.eq.s32.totalorder %v300_v7, %v366_v14  ;;  %1695 = vmatprep.subr.msk.mxu0 %vm380_vm0, %v1829_v19  ;;  %1717 = vmatprep.subr.msk.mxu1 %vm382_vm1, %v1829_v19  ;;  %vm378_vm5 = vcmp.eq.s32.totalorder %v1899_v10, %v370_v12  ;;  %vm375_vm6 = vcmp.eq.s32.totalorder %v1899_v10, %v358_v13  ;;  %v1184_v40 = vld [vmem:[%s2602_s4 + $0x20] sm:$0xff]  ;;  %v1183_v44 = vld [vmem:[%s2602_s4 + $0x18] sm:$0xff]  ;;  %v433_v45 = vld [vmem:[%s2601_s3 + $0x50] sm:$0xff] }
  0x16   : > { %1696 = vmatpush1.msk.msra.mxu0 %vm379_vm2, %v1829_v19  ;;  %1718 = vmatpush1.msk.msra.mxu1 %vm381_vm3, %v1829_v19  ;;  %vm377_vm7 = vcmp.eq.s32.totalorder %v1899_v10, %v366_v14  ;;  %vm372_vm8 = vcmp.eq.s32.totalorder %v1885_v2, %v362_v11  ;;  %vm374_vm9 = vcmp.eq.s32.totalorder %v1885_v2, %v370_v12  ;;  %v1180_v46 = vld [vmem:[%s2602_s4] sm:$0xff]  ;;  %v1181_v47 = vld [vmem:[%s2602_s4 + $0x8] sm:$0xff]  ;;  %v434_v48 = vld [vmem:[%s2601_s3 + $0x58] sm:$0xff] }
  0x17   : > { %1697 = vmatprep.subr.msk.mxu0 %vm376_vm4, %v1829_v19  ;;  %1719 = vmatprep.subr.msk.mxu1 %vm378_vm5, %v1829_v19  ;;  %vm371_vm10 = vcmp.eq.s32.totalorder %v1885_v2, %v358_v13  ;;  %vm373_vm11 = vcmp.eq.s32.totalorder %v1885_v2, %v366_v14  ;;  %v313_v20 = vrot.slane %v301_v15, %v312_v8  ;;  %v435_v49 = vld [vmem:[%s2601_s3 + $0x60] sm:$0xff]  ;;  %v436_v50 = vld [vmem:[%s2601_s3 + $0x68] sm:$0xff]  ;;  %v437_v51 = vld [vmem:[%s2601_s3 + $0x70] sm:$0xff] }
  0x18   : > { %1698 = vmatpush1.msk.msra.mxu0 %vm375_vm6, %v1829_v19  ;;  %1720 = vmatpush1.msk.msra.mxu1 %vm377_vm7, %v1829_v19  ;;  %vm327_vm13 = vcmp.eq.s32.totalorder %v300_v7, %v1905_v16  ;;  %vm329_vm14 = vcmp.eq.s32.totalorder %v300_v7, %v1907_v17  ;;  %vm326_vm15 = vcmp.eq.s32.totalorder %v300_v7, %v1909_v18  ;;  %v438_v52 = vld [vmem:[%s2601_s3 + $0x78] sm:$0xff]  ;;  %v407_v53 = vld [vmem:[%s2600_s2] sm:$0xff]  ;;  %v408_v54 = vld [vmem:[%s2600_s2 + $0x8] sm:$0xff] }
  0x19   : > { %1699 = vmatprep.subr.msk.mxu0 %vm372_vm8, %v1829_v19  ;;  %1721 = vmatprep.subr.msk.mxu1 %vm374_vm9, %v1829_v19  ;;  %vm328_vm0 = vcmp.eq.s32.totalorder %v300_v7, %v313_v20  ;;  %vm323_vm1 = vcmp.eq.s32.totalorder %v1899_v10, %v1905_v16  ;;  %vm325_vm2 = vcmp.eq.s32.totalorder %v1899_v10, %v1907_v17  ;;  %v409_v55 = vld [vmem:[%s2600_s2 + $0x10] sm:$0xff]  ;;  %v410_v56 = vld [vmem:[%s2600_s2 + $0x18] sm:$0xff]  ;;  %v411_v57 = vld [vmem:[%s2600_s2 + $0x20] sm:$0xff] }
  0x1a   : > { %1700 = vmatpush1.msk.msra.mxu0 %vm371_vm10, %v1829_v19  ;;  %1722 = vmatpush1.msk.msra.mxu1 %vm373_vm11, %v1829_v19  ;;  %vm322_vm3 = vcmp.eq.s32.totalorder %v1899_v10, %v1909_v18  ;;  %vm324_vm4 = vcmp.eq.s32.totalorder %v1899_v10, %v313_v20  ;;  %vm319_vm5 = vcmp.eq.s32.totalorder %v1885_v2, %v1905_v16  ;;  %v412_v58 = vld [vmem:[%s2600_s2 + $0x28] sm:$0xff]  ;;  %v413_v59 = vld [vmem:[%s2600_s2 + $0x30] sm:$0xff]  ;;  %v414_v60 = vld [vmem:[%s2600_s2 + $0x38] sm:$0xff] }
  0x1b   : > { %1701 = vmatmul.mubr.msk.f32.vlgmr.msra.gmra.mxu0 %vm439_vm12, %v423_v21  ;;  %1723 = vmatmul.mubr.msk.f32.vlgmr.msra.gmra.mxu1 %vm439_vm12, %v423_v21  ;;  %vm321_vm6 = vcmp.eq.s32.totalorder %v1885_v2, %v1907_v17  ;;  %vm318_vm7 = vcmp.eq.s32.totalorder %v1885_v2, %v1909_v18  ;;  %vm320_vm8 = vcmp.eq.s32.totalorder %v1885_v2, %v313_v20  ;;  %v415_v61 = vld [vmem:[%s2600_s2 + $0x40] sm:$0xff]  ;;  %v416_v62 = vld [vmem:[%s2600_s2 + $0x48] sm:$0xff]  ;;  %v417_v63 = vld [vmem:[%s2600_s2 + $0x50] sm:$0xff] }
  0x1c   : > { %558 = vmatprep.mubr.f32.mxu0 %v1827_v1  ;;  %719 = vmatprep.mubr.f32.mxu1 %v1827_v1  ;;  %v418_v3 = vld [vmem:[%s2600_s2 + $0x58] sm:$0xff]  ;;  %v419_v4 = vld [vmem:[%s2600_s2 + $0x60] sm:$0xff]  ;;  %v420_v5 = vld [vmem:[%s2600_s2 + $0x68] sm:$0xff] }
  0x1d   : > { %1739 = vmatprep.subr.msk.mxu0 %vm327_vm13, %v1829_v19  ;;  %1761 = vmatprep.subr.msk.mxu1 %vm329_vm14, %v1829_v19  ;;  %v421_v6 = vld [vmem:[%s2600_s2 + $0x70] sm:$0xff]  ;;  %v422_v7 = vld [vmem:[%s2600_s2 + $0x78] sm:$0xff] }
  0x1e   : > { %1740 = vmatpush1.msk.msra.mxu0 %vm326_vm15, %v1829_v19  ;;  %1762 = vmatpush1.msk.msra.mxu1 %vm328_vm0, %v1829_v19 }
  0x1f   : > { %1702 = vmatmul.mubr.msk.f32.gmra.mxu0 %vm439_vm12, %v424_v22  ;;  %1724 = vmatmul.mubr.msk.f32.gmra.mxu1 %vm439_vm12, %v424_v22 }
  0x20   : > { %564 = vmatprep.mubr.f32.mxu0 %v1827_v1  ;;  %725 = vmatprep.mubr.f32.mxu1 %v1827_v1 }
  0x21   : > { %1741 = vmatprep.subr.msk.mxu0 %vm323_vm1, %v1829_v19  ;;  %1763 = vmatprep.subr.msk.mxu1 %vm325_vm2, %v1829_v19 }
  0x22   : > { %1742 = vmatpush1.msk.msra.mxu0 %vm322_vm3, %v1829_v19  ;;  %1764 = vmatpush1.msk.msra.mxu1 %vm324_vm4, %v1829_v19 }
  0x23   : > { %1703 = vmatmul.mubr.msk.f32.gmra.mxu0 %vm439_vm12, %v425_v23  ;;  %1725 = vmatmul.mubr.msk.f32.gmra.mxu1 %vm439_vm12, %v425_v23 }
  0x24   : > { %570 = vmatprep.mubr.f32.mxu0 %v1827_v1  ;;  %731 = vmatprep.mubr.f32.mxu1 %v1827_v1 }
  0x25   : > { %1743 = vmatprep.subr.msk.mxu0 %vm319_vm5, %v1829_v19  ;;  %1765 = vmatprep.subr.msk.mxu1 %vm321_vm6, %v1829_v19 }
  0x26   : > { %1744 = vmatpush1.msk.msra.mxu0 %vm318_vm7, %v1829_v19  ;;  %1766 = vmatpush1.msk.msra.mxu1 %vm320_vm8, %v1829_v19 }
  0x27   : > { %1704 = vmatmul.mubr.msk.f32.gmra.mxu0 %vm439_vm12, %v426_v24  ;;  %1726 = vmatmul.mubr.msk.f32.gmra.mxu1 %vm439_vm12, %v426_v24 }
  0x28   : > { %576 = vmatprep.mubr.f32.mxu0 %v1827_v1  ;;  %737 = vmatprep.mubr.f32.mxu1 %v1827_v1 }
  0x29   : > { %1248 = vperm.xlu1 %1802, %v1190_v31   ;;  %1253 = vperm.xlu0 %1801, %v1191_v32  }
  0x2b   : > { %1705 = vmatmul.mubr.msk.f32.gmra.mxu0 %vm439_vm12, %v427_v27  ;;  %1727 = vmatmul.mubr.msk.f32.gmra.mxu1 %vm439_vm12, %v427_v27 }
  0x2c   : > { %582 = vmatprep.mubr.f32.mxu0 %v1827_v1  ;;  %743 = vmatprep.mubr.f32.mxu1 %v1827_v1 }
  0x2d   : > { %1238 = vperm.xlu1 %1802, %v1188_v34   ;;  %1243 = vperm.xlu0 %1801, %v1189_v35  }
  0x2f   : > { %1706 = vmatmul.mubr.msk.f32.gmra.mxu0 %vm439_vm12, %v428_v30  ;;  %1728 = vmatmul.mubr.msk.f32.gmra.mxu1 %vm439_vm12, %v428_v30 }
  0x30   : > { %588 = vmatprep.mubr.f32.mxu0 %v1827_v1  ;;  %749 = vmatprep.mubr.f32.mxu1 %v1827_v1 }
  0x31   : > { %1228 = vperm.xlu1 %1802, %v1186_v37   ;;  %1233 = vperm.xlu0 %1801, %v1187_v38  }
  0x33   : > { %1707 = vmatmul.mubr.msk.f32.gmra.mxu0 %vm439_vm12, %v429_v33  ;;  %1729 = vmatmul.mubr.msk.f32.gmra.mxu1 %vm439_vm12, %v429_v33 }
  0x34   : > { %594 = vmatprep.mubr.f32.mxu0 %v1827_v1  ;;  %755 = vmatprep.mubr.f32.mxu1 %v1827_v1 }
  0x35   : > { %1218 = vperm.xlu1 %1802, %v1184_v40   ;;  %1223 = vperm.xlu0 %1801, %v1185_v41  }
  0x37   : > { %1708 = vmatmul.mubr.msk.f32.gmra.mxu0 %vm439_vm12, %v430_v36  ;;  %1730 = vmatmul.mubr.msk.f32.gmra.mxu1 %vm439_vm12, %v430_v36 }
  0x38   : > { %600 = vmatprep.mubr.f32.mxu0 %v1827_v1  ;;  %761 = vmatprep.mubr.f32.mxu1 %v1827_v1 }
  0x39   : > { %1208 = vperm.xlu1 %1802, %v1182_v43   ;;  %1213 = vperm.xlu0 %1801, %v1183_v44  }
  0x3b   : > { %1709 = vmatmul.mubr.msk.f32.gmra.mxu0 %vm439_vm12, %v431_v39  ;;  %1731 = vmatmul.mubr.msk.f32.gmra.mxu1 %vm439_vm12, %v431_v39 }
  0x3c   : > { %606 = vmatprep.mubr.f32.mxu0 %v1827_v1  ;;  %767 = vmatprep.mubr.f32.mxu1 %v1827_v1 }
  0x3d   : > { %1198 = vperm.xlu1 %1802, %v1180_v46   ;;  %1203 = vperm.xlu0 %1801, %v1181_v47  }
  0x3f   : > { %1710 = vmatmul.mubr.msk.f32.gmra.mxu0 %vm439_vm12, %v432_v42  ;;  %1732 = vmatmul.mubr.msk.f32.gmra.mxu1 %vm439_vm12, %v432_v42 }
  0x40   : > { %612 = vmatprep.mubr.f32.mxu0 %v1827_v1  ;;  %773 = vmatprep.mubr.f32.mxu1 %v1827_v1 }
  0x43   : > { %1711 = vmatmul.mubr.msk.f32.gmra.mxu0 %vm439_vm12, %v433_v45  ;;  %1733 = vmatmul.mubr.msk.f32.gmra.mxu1 %vm439_vm12, %v433_v45 }
  0x44   : > { %618 = vmatprep.mubr.f32.mxu0 %v1827_v1  ;;  %779 = vmatprep.mubr.f32.mxu1 %v1827_v1 }
  0x47   : > { %1712 = vmatmul.mubr.msk.f32.gmra.mxu0 %vm439_vm12, %v434_v48  ;;  %1734 = vmatmul.mubr.msk.f32.gmra.mxu1 %vm439_vm12, %v434_v48 }
  0x48   : > { %624 = vmatprep.mubr.f32.mxu0 %v1827_v1  ;;  %785 = vmatprep.mubr.f32.mxu1 %v1827_v1 }
  0x4b   : > { %1713 = vmatmul.mubr.msk.f32.gmra.mxu0 %vm439_vm12, %v435_v49  ;;  %1735 = vmatmul.mubr.msk.f32.gmra.mxu1 %vm439_vm12, %v435_v49 }
  0x4c   : > { %630 = vmatprep.mubr.f32.mxu0 %v1827_v1  ;;  %791 = vmatprep.mubr.f32.mxu1 %v1827_v1 }
  0x4f   : > { %1714 = vmatmul.mubr.msk.f32.gmra.mxu0 %vm439_vm12, %v436_v50  ;;  %1736 = vmatmul.mubr.msk.f32.gmra.mxu1 %vm439_vm12, %v436_v50 }
  0x50   : > { %636 = vmatprep.mubr.f32.mxu0 %v1827_v1  ;;  %797 = vmatprep.mubr.f32.mxu1 %v1827_v1 }
  0x53   : > { %1715 = vmatmul.mubr.msk.f32.gmra.mxu0 %vm439_vm12, %v437_v51  ;;  %1737 = vmatmul.mubr.msk.f32.gmra.mxu1 %vm439_vm12, %v437_v51 }
  0x54   : > { %642 = vmatprep.mubr.f32.mxu0 %v1827_v1  ;;  %803 = vmatprep.mubr.f32.mxu1 %v1827_v1 }
  0x57   : > { %1716 = vmatmul.mubr.msk.f32.gmra.mxu0 %vm439_vm12, %v438_v52  ;;  %1738 = vmatmul.mubr.msk.f32.gmra.mxu1 %vm439_vm12, %v438_v52 }
  0x58   : > { %922 = vmatprep.mubr.f32.mxu0 %v1827_v1  ;;  %1083 = vmatprep.mubr.f32.mxu1 %v1827_v1 }
  0x5b   : > { %1745 = vmatmul.mubr.msk.f32.vlgmr.msra.gmra.mxu0 %vm439_vm12, %v407_v53  ;;  %1767 = vmatmul.mubr.msk.f32.vlgmr.msra.gmra.mxu1 %vm439_vm12, %v407_v53 }
  0x5c   : > { %928 = vmatprep.mubr.f32.mxu0 %v1827_v1  ;;  %1089 = vmatprep.mubr.f32.mxu1 %v1827_v1 }
  0x5f   : > { %1746 = vmatmul.mubr.msk.f32.gmra.mxu0 %vm439_vm12, %v408_v54  ;;  %1768 = vmatmul.mubr.msk.f32.gmra.mxu1 %vm439_vm12, %v408_v54 }
  0x60   : > { %934 = vmatprep.mubr.f32.mxu0 %v1827_v1  ;;  %1095 = vmatprep.mubr.f32.mxu1 %v1827_v1 }
  0x63   : > { %1747 = vmatmul.mubr.msk.f32.gmra.mxu0 %vm439_vm12, %v409_v55  ;;  %1769 = vmatmul.mubr.msk.f32.gmra.mxu1 %vm439_vm12, %v409_v55 }
  0x64   : > { %940 = vmatprep.mubr.f32.mxu0 %v1827_v1  ;;  %1101 = vmatprep.mubr.f32.mxu1 %v1827_v1 }
  0x67   : > { %1748 = vmatmul.mubr.msk.f32.gmra.mxu0 %vm439_vm12, %v410_v56  ;;  %1770 = vmatmul.mubr.msk.f32.gmra.mxu1 %vm439_vm12, %v410_v56 }
  0x68   : > { %946 = vmatprep.mubr.f32.mxu0 %v1827_v1  ;;  %1107 = vmatprep.mubr.f32.mxu1 %v1827_v1 }
  0x6b   : > { %1749 = vmatmul.mubr.msk.f32.gmra.mxu0 %vm439_vm12, %v411_v57  ;;  %1771 = vmatmul.mubr.msk.f32.gmra.mxu1 %vm439_vm12, %v411_v57 }
  0x6c   : > { %952 = vmatprep.mubr.f32.mxu0 %v1827_v1  ;;  %1113 = vmatprep.mubr.f32.mxu1 %v1827_v1 }
  0x6f   : > { %1750 = vmatmul.mubr.msk.f32.gmra.mxu0 %vm439_vm12, %v412_v58  ;;  %1772 = vmatmul.mubr.msk.f32.gmra.mxu1 %vm439_vm12, %v412_v58 }
  0x70   : > { %958 = vmatprep.mubr.f32.mxu0 %v1827_v1  ;;  %1119 = vmatprep.mubr.f32.mxu1 %v1827_v1 }
  0x73   : > { %1751 = vmatmul.mubr.msk.f32.gmra.mxu0 %vm439_vm12, %v413_v59  ;;  %1773 = vmatmul.mubr.msk.f32.gmra.mxu1 %vm439_vm12, %v413_v59 }
  0x74   : > { %964 = vmatprep.mubr.f32.mxu0 %v1827_v1  ;;  %1125 = vmatprep.mubr.f32.mxu1 %v1827_v1 }
  0x77   : > { %1752 = vmatmul.mubr.msk.f32.gmra.mxu0 %vm439_vm12, %v414_v60  ;;  %1774 = vmatmul.mubr.msk.f32.gmra.mxu1 %vm439_vm12, %v414_v60 }
  0x78   : > { %970 = vmatprep.mubr.f32.mxu0 %v1827_v1  ;;  %1131 = vmatprep.mubr.f32.mxu1 %v1827_v1 }
  0x7b   : > { %1753 = vmatmul.mubr.msk.f32.gmra.mxu0 %vm439_vm12, %v415_v61  ;;  %1775 = vmatmul.mubr.msk.f32.gmra.mxu1 %vm439_vm12, %v415_v61 }
  0x7c   : > { %976 = vmatprep.mubr.f32.mxu0 %v1827_v1  ;;  %1137 = vmatprep.mubr.f32.mxu1 %v1827_v1 }
  0x7f   : > { %1754 = vmatmul.mubr.msk.f32.gmra.mxu0 %vm439_vm12, %v416_v62  ;;  %1776 = vmatmul.mubr.msk.f32.gmra.mxu1 %vm439_vm12, %v416_v62 }
  0x80   : > { %982 = vmatprep.mubr.f32.mxu0 %v1827_v1  ;;  %1143 = vmatprep.mubr.f32.mxu1 %v1827_v1 }
  0x83   : > { %1755 = vmatmul.mubr.msk.f32.gmra.mxu0 %vm439_vm12, %v417_v63  ;;  %1777 = vmatmul.mubr.msk.f32.gmra.mxu1 %vm439_vm12, %v417_v63 }
  0x84   : > { %988 = vmatprep.mubr.f32.mxu0 %v1827_v1  ;;  %1149 = vmatprep.mubr.f32.mxu1 %v1827_v1 }
  0x87   : > { %1756 = vmatmul.mubr.msk.f32.gmra.mxu0 %vm439_vm12, %v418_v3  ;;  %1778 = vmatmul.mubr.msk.f32.gmra.mxu1 %vm439_vm12, %v418_v3 }
  0x88   : > { %994 = vmatprep.mubr.f32.mxu0 %v1827_v1  ;;  %1155 = vmatprep.mubr.f32.mxu1 %v1827_v1 }
  0x8b   : > { %1757 = vmatmul.mubr.msk.f32.gmra.mxu0 %vm439_vm12, %v419_v4  ;;  %1779 = vmatmul.mubr.msk.f32.gmra.mxu1 %vm439_vm12, %v419_v4 }
  0x8c   : > { %1000 = vmatprep.mubr.f32.mxu0 %v1827_v1  ;;  %1161 = vmatprep.mubr.f32.mxu1 %v1827_v1 }
  0x8f   : > { %1758 = vmatmul.mubr.msk.f32.gmra.mxu0 %vm439_vm12, %v420_v5  ;;  %1780 = vmatmul.mubr.msk.f32.gmra.mxu1 %vm439_vm12, %v420_v5 }
  0x90   : > { %1006 = vmatprep.mubr.f32.mxu0 %v1827_v1  ;;  %1167 = vmatprep.mubr.f32.mxu1 %v1827_v1 }
  0x93   : > { %1759 = vmatmul.mubr.msk.f32.gmra.mxu0 %vm439_vm12, %v421_v6  ;;  %1781 = vmatmul.mubr.msk.f32.gmra.mxu1 %vm439_vm12, %v421_v6 }
  0x94   : > { %1012 = vmatprep.mubr.f32.mxu0 %v1827_v1  ;;  %1173 = vmatprep.mubr.f32.mxu1 %v1827_v1 }
  0x97   : > { %1760 = vmatmul.mubr.msk.f32.gmra.mxu0 %vm439_vm12, %v422_v7  ;;  %1782 = vmatmul.mubr.msk.f32.gmra.mxu1 %vm439_vm12, %v422_v7 }
  0x98   : > { %1471 = vmatprep.mubr.f32.mxu0 %v1827_v1  ;;  %1542 = vmatprep.mubr.f32.mxu1 %v1827_v1 }
  0xdb   : > { %v2208_v8 = vpop.f32.mrf.mxu0  ;;  %v2210_v9 = vpop.f32.mrf.mxu1 }
  0xdd   : > { %v2212_v10 = vpop.f32.mrf.mxu0  ;;  %v2214_v11 = vpop.f32.mrf.mxu1 }
  0xdf   : > { %v2216_v12 = vpop.f32.mrf.mxu0  ;;  %v2218_v13 = vpop.f32.mrf.mxu1 }
  0xe1   : > { %v2220_v14 = vpop.f32.mrf.mxu0  ;;  %v2222_v15 = vpop.f32.mrf.mxu1 }
  0xe3   : > { %v2224_v16 = vpop.f32.mrf.mxu0  ;;  %v2226_v17 = vpop.f32.mrf.mxu1 }
  0xe5   : > { %v2228_v1 = vpop.f32.mrf.mxu0  ;;  %v2230_v18 = vpop.f32.mrf.mxu1 }
  0xe7   : > { %v2232_v19 = vpop.f32.mrf.mxu0  ;;  %v2234_v20 = vpop.f32.mrf.mxu1 }
  0xe9   : > { %v2236_v21 = vpop.f32.mrf.mxu0  ;;  %v2238_v22 = vpop.f32.mrf.mxu1 }
  0xeb   : > { %v2240_v23 = vpop.f32.mrf.mxu0  ;;  %v2242_v24 = vpop.f32.mrf.mxu1 }
  0xed   : > { %v2244_v25 = vpop.f32.mrf.mxu0  ;;  %v2246_v26 = vpop.f32.mrf.mxu1 }
  0xef   : > { %v2248_v27 = vpop.f32.mrf.mxu0  ;;  %v2250_v28 = vpop.f32.mrf.mxu1 }
  0xf1   : > { %v2252_v29 = vpop.f32.mrf.mxu0  ;;  %v2254_v30 = vpop.f32.mrf.mxu1 }
  0xf3   : > { %v2256_v31 = vpop.f32.mrf.mxu0  ;;  %v2258_v32 = vpop.f32.mrf.mxu1 }
  0xf5   : > { %v2260_v33 = vpop.f32.mrf.mxu0  ;;  %v2262_v34 = vpop.f32.mrf.mxu1 }
  0xf7   : > { %v2264_v35 = vpop.f32.mrf.mxu0  ;;  %v2266_v36 = vpop.f32.mrf.mxu1 }
  0xf9   : > { %v2268_v37 = vpop.f32.mrf.mxu0  ;;  %v2270_v38 = vpop.f32.mrf.mxu1 }
  0xfb   : > { %v2272_v39 = vpop.f32.mrf.mxu0  ;;  %v2274_v40 = vpop.f32.mrf.mxu1 }
  0xfd   : > { %v2276_v41 = vpop.f32.mrf.mxu0  ;;  %v2278_v42 = vpop.f32.mrf.mxu1 }
  0xff   : > { %v2280_v43 = vpop.f32.mrf.mxu0  ;;  %v2282_v44 = vpop.f32.mrf.mxu1 }
 0x101   : > { %v2284_v45 = vpop.f32.mrf.mxu0  ;;  %v2286_v46 = vpop.f32.mrf.mxu1 }
 0x103   : > { %v2288_v47 = vpop.f32.mrf.mxu0  ;;  %v2290_v48 = vpop.f32.mrf.mxu1 }
 0x105   : > { %v2292_v49 = vpop.f32.mrf.mxu0  ;;  %v2294_v50 = vpop.f32.mrf.mxu1 }
 0x106   : > { %2612 = vst [vmem:[#allocation4_spill] sm:$0xff] %v2294_v50 }
 0x107   : > { %v2296_v51 = vpop.f32.mrf.mxu0  ;;  %v2298_v52 = vpop.f32.mrf.mxu1 }
 0x108   : > { %2613 = vst [vmem:[#allocation5_spill] sm:$0xff] %v2296_v51  ;;  %2614 = vst [vmem:[#allocation6_spill] sm:$0xff] %v2298_v52 }
 0x109   : > { %v2300_v53 = vpop.f32.mrf.mxu0  ;;  %v2302_v54 = vpop.f32.mrf.mxu1 }
 0x10a   : > { %2615 = vst [vmem:[#allocation7_spill] sm:$0xff] %v2300_v53  ;;  %2616 = vst [vmem:[#allocation8_spill] sm:$0xff] %v2302_v54 }
 0x10b   : > { %v2304_v55 = vpop.f32.mrf.mxu0  ;;  %v2306_v56 = vpop.f32.mrf.mxu1 }
 0x10c   : > { %2617 = vst [vmem:[#allocation9_spill] sm:$0xff] %v2304_v55  ;;  %2618 = vst [vmem:[#allocation10_spill] sm:$0xff] %v2306_v56 }
 0x10d   : > { %v2308_v57 = vpop.f32.mrf.mxu0  ;;  %v2310_v58 = vpop.f32.mrf.mxu1 }
 0x10e   : > { %2619 = vst [vmem:[#allocation11_spill] sm:$0xff] %v2308_v57  ;;  %2620 = vst [vmem:[#allocation12_spill] sm:$0xff] %v2310_v58 }
 0x10f   : > { %v2312_v59 = vpop.f32.mrf.mxu0  ;;  %v2314_v60 = vpop.f32.mrf.mxu1 }
 0x110   : > { %2621 = vst [vmem:[#allocation13_spill] sm:$0xff] %v2312_v59  ;;  %2622 = vst [vmem:[#allocation14_spill] sm:$0xff] %v2314_v60 }
 0x111   : > { %v2316_v61 = vpop.f32.mrf.mxu0  ;;  %v2318_v62 = vpop.f32.mrf.mxu1 }
 0x112   : > { %2623 = vst [vmem:[#allocation15_spill] sm:$0xff] %v2316_v61  ;;  %2624 = vst [vmem:[#allocation16_spill] sm:$0xff] %v2318_v62 }
 0x113   : > { %v2320_v63 = vpop.f32.mrf.mxu0  ;;  %v2322_v3 = vpop.f32.mrf.mxu1 }
 0x114   : > { %2625 = vst [vmem:[#allocation17_spill] sm:$0xff] %v2320_v63  ;;  %2626 = vst [vmem:[#allocation18_spill] sm:$0xff] %v2322_v3 }
 0x115   : > { %v2324_v4 = vpop.f32.mrf.mxu0  ;;  %v2326_v5 = vpop.f32.mrf.mxu1 }
 0x116   : > { %2627 = vst [vmem:[#allocation19_spill] sm:$0xff] %v2324_v4  ;;  %2628 = vst [vmem:[#allocation20_spill] sm:$0xff] %v2326_v5 }
 0x117   : > { %v2328_v6 = vpop.f32.mrf.mxu0  ;;  %v2330_v7 = vpop.f32.mrf.mxu1 }
 0x118   : > { %2629 = vst [vmem:[#allocation21_spill] sm:$0xff] %v2328_v6  ;;  %2630 = vst [vmem:[#allocation22_spill] sm:$0xff] %v2330_v7 }
 0x119   : > { %v2332_v0 = vpop.f32.mrf.mxu0  ;;  %v2334_v2 = vpop.f32.mrf.mxu1 }
 0x11a   : > { %2631 = vst [vmem:[#allocation23_spill] sm:$0xff] %v2332_v0  ;;  %2632 = vst [vmem:[#allocation24_spill] sm:$0xff] %v2334_v2 }
 0x11b   : > { %v924_v56 = vpop.f32.mrf.mxu0  ;;  %v1085_v55 = vpop.f32.mrf.mxu1 }
 0x11c   : > { %v2337_v60 = vadd.f32 %v924_v56, %v2208_v8  ;;  %v2340_v59 = vadd.f32 %v1085_v55, %v2210_v9 }
 0x11d   : > { %v926_v62 = vpop.f32.mrf.mxu0  ;;  %v1087_v61 = vpop.f32.mrf.mxu1 }
 0x11e   : > { %2633 = vst [vmem:[#allocation25_spill] sm:$0xff] %v2337_v60  ;;  %2634 = vst [vmem:[#allocation26_spill] sm:$0xff] %v2340_v59  ;;  %v2343_v3 = vadd.f32 %v926_v62, %v2212_v10  ;;  %v2346_v63 = vadd.f32 %v1087_v61, %v2214_v11 }
 0x11f   : > { %v930_v58 = vpop.f32.mrf.mxu0  ;;  %v1091_v0 = vpop.f32.mrf.mxu1 }
 0x120   : > { %2635 = vst [vmem:[#allocation27_spill] sm:$0xff] %v2343_v3  ;;  %2636 = vst [vmem:[#allocation28_spill] sm:$0xff] %v2346_v63  ;;  %v2349_v2 = vadd.f32 %v930_v58, %v2216_v12  ;;  %v2352_v57 = vadd.f32 %v1091_v0, %v2218_v13 }
 0x121   : > { %v932_v8 = vpop.f32.mrf.mxu0  ;;  %v1093_v56 = vpop.f32.mrf.mxu1 }
 0x122   : > { %2637 = vst [vmem:[#allocation29_spill] sm:$0xff] %v2349_v2  ;;  %2638 = vst [vmem:[#allocation30_spill] sm:$0xff] %v2352_v57  ;;  %v2355_v9 = vadd.f32 %v932_v8, %v2220_v14  ;;  %v2358_v55 = vadd.f32 %v1093_v56, %v2222_v15 }
 0x123   : > { %v936_v10 = vpop.f32.mrf.mxu0  ;;  %v1097_v62 = vpop.f32.mrf.mxu1 }
 0x124   : > { %2639 = vst [vmem:[#allocation31_spill] sm:$0xff] %v2355_v9  ;;  %2640 = vst [vmem:[#allocation32_spill] sm:$0xff] %v2358_v55  ;;  %v2361_v11 = vadd.f32 %v936_v10, %v2224_v16  ;;  %v2364_v61 = vadd.f32 %v1097_v62, %v2226_v17 }
 0x125   : > { %v938_v12 = vpop.f32.mrf.mxu0  ;;  %v1099_v58 = vpop.f32.mrf.mxu1 }
 0x126   : > { %2641 = vst [vmem:[#allocation33_spill] sm:$0xff] %v2361_v11  ;;  %2642 = vst [vmem:[#allocation34_spill] sm:$0xff] %v2364_v61  ;;  %v2367_v0 = vadd.f32 %v938_v12, %v2228_v1  ;;  %v2370_v13 = vadd.f32 %v1099_v58, %v2230_v18 }
 0x127   : > { %v942_v14 = vpop.f32.mrf.mxu0  ;;  %v1103_v8 = vpop.f32.mrf.mxu1 }
 0x128   : > { %2643 = vst [vmem:[#allocation35_spill] sm:$0xff] %v2367_v0  ;;  %2644 = vst [vmem:[#allocation36_spill] sm:$0xff] %v2370_v13  ;;  %v2373_v15 = vadd.f32 %v942_v14, %v2232_v19  ;;  %v2376_v56 = vadd.f32 %v1103_v8, %v2234_v20 }
 0x129   : > { %v944_v16 = vpop.f32.mrf.mxu0  ;;  %v1105_v10 = vpop.f32.mrf.mxu1 }
 0x12a   : > { %2645 = vst [vmem:[#allocation37_spill] sm:$0xff] %v2373_v15  ;;  %2646 = vst [vmem:[#allocation38_spill] sm:$0xff] %v2376_v56  ;;  %v2379_v17 = vadd.f32 %v944_v16, %v2236_v21  ;;  %v2382_v62 = vadd.f32 %v1105_v10, %v2238_v22 }
 0x12b   : > { %v948_v1 = vpop.f32.mrf.mxu0  ;;  %v1109_v12 = vpop.f32.mrf.mxu1 }
 0x12c   : > { %2647 = vst [vmem:[#allocation39_spill] sm:$0xff] %v2379_v17  ;;  %2648 = vst [vmem:[#allocation40_spill] sm:$0xff] %v2382_v62  ;;  %v2385_v18 = vadd.f32 %v948_v1, %v2240_v23  ;;  %v2388_v58 = vadd.f32 %v1109_v12, %v2242_v24 }
 0x12d   : > { %v950_v19 = vpop.f32.mrf.mxu0  ;;  %v1111_v14 = vpop.f32.mrf.mxu1 }
 0x12e   : > { %2649 = vst [vmem:[#allocation41_spill] sm:$0xff] %v2385_v18  ;;  %2650 = vst [vmem:[#allocation42_spill] sm:$0xff] %v2388_v58  ;;  %v2391_v20 = vadd.f32 %v950_v19, %v2244_v25  ;;  %v2394_v8 = vadd.f32 %v1111_v14, %v2246_v26  ;;  %v2396_v58 = vpop.permute.xlu0 %1273 }
 0x12f   : > { %v954_v21 = vpop.f32.mrf.mxu0  ;;  %v1115_v16 = vpop.f32.mrf.mxu1  ;;  %2653 = vst [vmem:[#allocation45_spill] sm:$0xff] %v2396_v58 }
 0x130   : > { %2651 = vst [vmem:[#allocation43_spill] sm:$0xff] %v2391_v20  ;;  %2652 = vst [vmem:[#allocation44_spill] sm:$0xff] %v2394_v8  ;;  %v2402_v20 = vpop.permute.xlu1 %1263  ;;  %v2407_v53 = vadd.f32 %v954_v21, %v2248_v27  ;;  %v2410_v52 = vadd.f32 %v1115_v16, %v2250_v28 }
 0x131   : > { %v956_v22 = vpop.f32.mrf.mxu0  ;;  %v1117_v10 = vpop.f32.mrf.mxu1  ;;  %2656 = vst [vmem:[#allocation48_spill] sm:$0xff] %v2402_v20 }
 0x132   : > { %v2404_v54 = vpop.permute.xlu0 %1268  ;;  %v2413_v58 = vadd.f32 %v956_v22, %v2252_v29  ;;  %v2662_v22 = vld [vmem:[#allocation8_spill] sm:$0xff] }
 0x133   : > { %v960_v59 = vpop.f32.mrf.mxu0  ;;  %v1121_v60 = vpop.f32.mrf.mxu1  ;;  %2657 = vst [vmem:[#allocation49_spill] sm:$0xff] %v2404_v54 }
 0x134   : > { %v2418_v51 = vpop.permute.xlu1 %1258  ;;  %v2421_v50 = vadd.f32 %v960_v59, %v2256_v31  ;;  %v2424_v54 = vadd.f32 %v1121_v60, %v2258_v32 }
 0x135   : > { %v962_v63 = vpop.f32.mrf.mxu0  ;;  %v1123_v23 = vpop.f32.mrf.mxu1 }
 0x136   : > { %v2427_v27 = vadd.f32 %v962_v63, %v2260_v33  ;;  %v2430_v28 = vadd.f32 %v1123_v23, %v2262_v34 }
 0x137   : > { %v966_v1 = vpop.f32.mrf.mxu0  ;;  %v1127_v3 = vpop.f32.mrf.mxu1 }
 0x138   : > { %v2433_v29 = vadd.f32 %v966_v1, %v2264_v35  ;;  %v2664_v1 = vld [vmem:[#allocation20_spill] sm:$0xff] }
 0x139   : > { %v968_v24 = vpop.f32.mrf.mxu0  ;;  %v1129_v12 = vpop.f32.mrf.mxu1 }
 0x13a   : > { %v2439_v21 = vadd.f32 %v968_v24, %v2268_v37  ;;  %v2442_v31 = vadd.f32 %v1129_v12, %v2270_v38 }
 0x13b   : > { %v972_v57 = vpop.f32.mrf.mxu0  ;;  %v1133_v2 = vpop.f32.mrf.mxu1 }
 0x13c   : > { %v2445_v33 = vadd.f32 %v972_v57, %v2272_v39  ;;  %v2448_v34 = vadd.f32 %v1133_v2, %v2274_v40  ;;  %v2468_v57 = vpop.permute.xlu0 %1253 }
 0x13d   : > { %v974_v55 = vpop.f32.mrf.mxu0  ;;  %v1135_v25 = vpop.f32.mrf.mxu1 }
 0x13e   : > { %v2451_v35 = vadd.f32 %v974_v55, %v2276_v41  ;;  %v2661_v55 = vld [vmem:[#allocation7_spill] sm:$0xff] }
 0x13f   : > { %v978_v19 = vpop.f32.mrf.mxu0  ;;  %v1139_v9 = vpop.f32.mrf.mxu1 }
 0x140   : > { %v2457_v37 = vadd.f32 %v978_v19, %v2280_v43  ;;  %v2460_v38 = vadd.f32 %v1139_v9, %v2282_v44  ;;  %v2658_v44 = vld [vmem:[#allocation4_spill] sm:$0xff] }
 0x141   : > { %v980_v26 = vpop.f32.mrf.mxu0  ;;  %v1141_v14 = vpop.f32.mrf.mxu1  ;;  %v2668_v19 = vld [vmem:[#allocation12_spill] sm:$0xff] }
 0x142   : > { %v2463_v60 = vadd.f32 %v980_v26, %v2284_v45  ;;  %v2466_v39 = vadd.f32 %v1141_v14, %v2286_v46  ;;  %v2659_v45 = vld [vmem:[#allocation5_spill] sm:$0xff]  ;;  %v2660_v46 = vld [vmem:[#allocation6_spill] sm:$0xff] }
 0x143   : > { %v984_v61 = vpop.f32.mrf.mxu0  ;;  %v1145_v11 = vpop.f32.mrf.mxu1  ;;  %v2669_v26 = vld [vmem:[#allocation17_spill] sm:$0xff]  ;;  %v2670_v14 = vld [vmem:[#allocation18_spill] sm:$0xff] }
 0x144   : > { %v2471_v41 = vadd.f32 %v984_v61, %v2288_v47  ;;  %v2486_v61 = vpop.permute.xlu1 %1248 }
 0x145   : > { %v986_v13 = vpop.f32.mrf.mxu0  ;;  %v1147_v0 = vpop.f32.mrf.mxu1 }
 0x146   : > { %v2477_v43 = vadd.f32 %v986_v13, %v2292_v49  ;;  %v2480_v63 = vadd.f32 %v1147_v0, %v2658_v44  ;;  %v2665_v13 = vld [vmem:[#allocation21_spill] sm:$0xff]  ;;  %v2666_v0 = vld [vmem:[#allocation22_spill] sm:$0xff] }
 0x147   : > { %v990_v56 = vpop.f32.mrf.mxu0  ;;  %v1151_v15 = vpop.f32.mrf.mxu1 }
 0x148   : > { %v1152_v9 = vadd.f32 %v1151_v15, %v2660_v46  ;;  %v2671_v46 = vld [vmem:[#allocation15_spill] sm:$0xff] }
 0x149   : > { %v992_v62 = vpop.f32.mrf.mxu0  ;;  %v1153_v17 = vpop.f32.mrf.mxu1 }
 0x14a   : > { %v993_v16 = vadd.f32 %v992_v62, %v2661_v55 }
 0x14b   : > { %v2398_v18 = vpop.f32.mrf.mxu0  ;;  %v2400_v8 = vpop.f32.mrf.mxu1 }
 0x14c   : > { %2654 = vst [vmem:[#allocation46_spill] sm:$0xff] %v2398_v18  ;;  %2655 = vst [vmem:[#allocation47_spill] sm:$0xff] %v2400_v8  ;;  %v2416_v18 = vadd.f32 %v1117_v10, %v2254_v30  ;;  %v2436_v30 = vadd.f32 %v1127_v3, %v2266_v36  ;;  %v2454_v36 = vadd.f32 %v1135_v25, %v2278_v42  ;;  %v2667_v25 = vld [vmem:[#allocation11_spill] sm:$0xff] }
 0x14d   : > { %v998_v7 = vpop.f32.mrf.mxu0  ;;  %v1159_v6 = vpop.f32.mrf.mxu1  ;;  %v2474_v42 = vadd.f32 %v1145_v11, %v2290_v48  ;;  %v991_v3 = vadd.f32 %v990_v56, %v2659_v45  ;;  %v1154_v10 = vadd.f32 %v1153_v17, %v2662_v22  ;;  %v2663_v48 = vld [vmem:[#allocation19_spill] sm:$0xff]  ;;  %v2672_v22 = vld [vmem:[#allocation16_spill] sm:$0xff] }
 0x14e   : > { %v999_v56 = vadd.f32 %v998_v7, %v2667_v25  ;;  %v1160_v15 = vadd.f32 %v1159_v6, %v2668_v19  ;;  %v2677_v25 = vld [vmem:[#allocation45_spill] sm:$0xff]  ;;  %v2504_v19 = vpop.permute.xlu0 %1243 }
 0x14f   : > { %v1002_v5 = vpop.f32.mrf.mxu0  ;;  %v1163_v4 = vpop.f32.mrf.mxu1 }
 0x151   : > { %v1004_v8 = vpop.f32.mrf.mxu0  ;;  %v1165_v20 = vpop.f32.mrf.mxu1 }
 0x152   : > { %v1005_v55 = vadd.f32 %v1004_v8, %v2671_v46 }
 0x153   : > { %v1008_v32 = vpop.f32.mrf.mxu0  ;;  %v1169_v59 = vpop.f32.mrf.mxu1 }
 0x154   : > { %v1009_v62 = vadd.f32 %v1008_v32, %v2669_v26  ;;  %v1170_v17 = vadd.f32 %v1169_v59, %v2670_v14  ;;  %v2678_v59 = vld [vmem:[#allocation49_spill] sm:$0xff] }
 0x155   : > { %v1010_v2 = vpop.f32.mrf.mxu0  ;;  %v1171_v40 = vpop.f32.mrf.mxu1 }
 0x156   : > { %v1011_v11 = vadd.f32 %v1010_v2, %v2663_v48  ;;  %v1172_v49 = vadd.f32 %v1171_v40, %v2664_v1  ;;  %v1166_v2 = vadd.f32 %v1165_v20, %v2672_v22  ;;  %v2673_v48 = vld [vmem:[#allocation23_spill] sm:$0xff]  ;;  %v2674_v1 = vld [vmem:[#allocation24_spill] sm:$0xff] }
 0x157   : > { %v1014_v23 = vpop.f32.mrf.mxu0  ;;  %v1175_v47 = vpop.f32.mrf.mxu1  ;;  %v2682_v22 = vld [vmem:[#allocation47_spill] sm:$0xff] }
 0x158   : > { %v1015_v24 = vadd.f32 %v1014_v23, %v2665_v13  ;;  %v1176_v12 = vadd.f32 %v1175_v47, %v2666_v0  ;;  %v2675_v13 = vld [vmem:[#allocation13_spill] sm:$0xff]  ;;  %v2676_v0 = vld [vmem:[#allocation14_spill] sm:$0xff]  ;;  %v1333_v26 = vadd.f32 %v2678_v59, %v1011_v11  ;;  %v1335_v8 = vadd.f32 %v2678_v59, %v1172_v49 }
 0x159   : > { %v1016_v44 = vpop.f32.mrf.mxu0  ;;  %v1177_v45 = vpop.f32.mrf.mxu1  ;;  %v1003_v47 = vadd.f32 %v1002_v5, %v2675_v13  ;;  %v1164_v7 = vadd.f32 %v1163_v4, %v2676_v0  ;;  %v2681_v5 = vld [vmem:[#allocation10_spill] sm:$0xff] }
 0x15a   : > { %v1017_v40 = vadd.f32 %v1016_v44, %v2673_v48  ;;  %v1178_v23 = vadd.f32 %v1177_v45, %v2674_v1  ;;  %v1336_v6 = vadd.f32 %v2677_v25, %v1015_v24  ;;  %v1338_v32 = vadd.f32 %v2677_v25, %v1176_v12  ;;  %v2679_v44 = vld [vmem:[#allocation9_spill] sm:$0xff]  ;;  %v2680_v45 = vld [vmem:[#allocation46_spill] sm:$0xff]  ;;  %v2516_v48 = vpop.permute.xlu1 %1238  ;;  %v2683_v1 = vld [vmem:[#allocation48_spill] sm:$0xff] }
 0x15b   : > { %v997_v46 = vadd.f32 %v2680_v45, %v2679_v44  ;;  %v1158_v4 = vadd.f32 %v2682_v22, %v2681_v5  ;;  %v1332_v24 = vadd.f32 %v2678_v59, %v1009_v62  ;;  %v1334_v12 = vadd.f32 %v2678_v59, %v1170_v17 }
 0x15c   : > { %v1337_v20 = vadd.f32 %v2677_v25, %v1017_v40  ;;  %v1339_v14 = vadd.f32 %v2677_v25, %v1178_v23  ;;  %v1329_v11 = vadd.f32 %v2683_v1, %v1005_v55  ;;  %v1331_v49 = vadd.f32 %v2683_v1, %v1166_v2 }
 0x15d   : > { %v1328_v23 = vadd.f32 %v2683_v1, %v1003_v47  ;;  %v1330_v0 = vadd.f32 %v2683_v1, %v1164_v7  ;;  %v1400_v25 = vmax.f32 %v1336_v6, 0.0  ;;  %v1402_v44 = vmax.f32 %v1338_v32, 0.0  ;;  %v1234_v47 = vpop.permute.xlu0 %1233 }
 0x15e   : > { %v1401_v13 = vmax.f32 %v1337_v20, 0.0  ;;  %v1403_v40 = vmax.f32 %v1339_v14, 0.0  ;;  %v1325_v45 = vadd.f32 %v2418_v51, %v999_v56  ;;  %v1327_v62 = vadd.f32 %v2418_v51, %v1160_v15 }
 0x15f   : > { %v1397_v5 = vmax.f32 %v1333_v26, 0.0  ;;  %v1399_v17 = vmax.f32 %v1335_v8, 0.0  ;;  %v1324_v55 = vadd.f32 %v2418_v51, %v997_v46  ;;  %v1326_v2 = vadd.f32 %v2418_v51, %v1158_v4  ;;  %v1229_v51 = vpop.permute.xlu1 %1228 }
 0x160   : > { %1407 = vmatprep.subr.mxu0 %v1401_v13  ;;  %1478 = vmatprep.subr.mxu1 %v1403_v40  ;;  %v1396_v59 = vmax.f32 %v1332_v24, 0.0  ;;  %v1398_v20 = vmax.f32 %v1334_v12, 0.0  ;;  %v1321_v7 = vadd.f32 %v2468_v57, %v993_v16  ;;  %v1323_v6 = vadd.f32 %v2468_v57, %v1154_v10 }
 0x161   : > { %1408 = vmatpush1.msra.mxu0 %v1400_v25  ;;  %1479 = vmatpush1.msra.mxu1 %v1402_v44  ;;  %v1393_v56 = vmax.f32 %v1329_v11, 0.0  ;;  %v1395_v32 = vmax.f32 %v1331_v49, 0.0  ;;  %v1320_v15 = vadd.f32 %v2468_v57, %v991_v3  ;;  %v1322_v26 = vadd.f32 %v2468_v57, %v1152_v9  ;;  %v1224_v11 = vpop.permute.xlu0 %1223 }
 0x162   : > { %1409 = vmatprep.subr.mxu0 %v1397_v5  ;;  %1480 = vmatprep.subr.mxu1 %v1399_v17  ;;  %v1392_v8 = vmax.f32 %v1328_v23, 0.0  ;;  %v1394_v14 = vmax.f32 %v1330_v0, 0.0  ;;  %v1317_v46 = vadd.f32 %v2486_v61, %v2477_v43  ;;  %v1319_v16 = vadd.f32 %v2486_v61, %v2480_v63 }
 0x163   : > { %1410 = vmatpush1.msra.mxu0 %v1396_v59  ;;  %1481 = vmatpush1.msra.mxu1 %v1398_v20  ;;  %v1389_v10 = vmax.f32 %v1325_v45, 0.0  ;;  %v1391_v22 = vmax.f32 %v1327_v62, 0.0  ;;  %v1316_v3 = vadd.f32 %v2486_v61, %v2471_v41  ;;  %v1318_v57 = vadd.f32 %v2486_v61, %v2474_v42  ;;  %v1219_v23 = vpop.permute.xlu1 %1218 }
 0x164   : > { %1411 = vmatprep.subr.mxu0 %v1393_v56  ;;  %1482 = vmatprep.subr.mxu1 %v1395_v32  ;;  %v1388_v9 = vmax.f32 %v1324_v55, 0.0  ;;  %v1390_v4 = vmax.f32 %v1326_v2, 0.0  ;;  %v1313_v43 = vadd.f32 %v2504_v19, %v2463_v60  ;;  %v1315_v63 = vadd.f32 %v2504_v19, %v2466_v39  ;;  %v2685_v32 = vld [vmem:[#allocation44_spill] sm:$0xff] }
 0x165   : > { %1412 = vmatpush1.msra.mxu0 %v1392_v8  ;;  %1483 = vmatpush1.msra.mxu1 %v1394_v14  ;;  %v1385_v24 = vmax.f32 %v1321_v7, 0.0  ;;  %v1387_v12 = vmax.f32 %v1323_v6, 0.0  ;;  %v1312_v41 = vadd.f32 %v2504_v19, %v2457_v37  ;;  %v1314_v42 = vadd.f32 %v2504_v19, %v2460_v38  ;;  %v2684_v6 = vld [vmem:[#allocation43_spill] sm:$0xff]  ;;  %v2687_v14 = vld [vmem:[#allocation42_spill] sm:$0xff] }
 0x166   : > { %1413 = vmatprep.subr.mxu0 %v1389_v10  ;;  %1484 = vmatprep.subr.mxu1 %v1391_v22  ;;  %v1384_v61 = vmax.f32 %v1320_v15, 0.0  ;;  %v1386_v1 = vmax.f32 %v1322_v26, 0.0  ;;  %v1309_v60 = vadd.f32 %v2516_v48, %v2451_v35  ;;  %v1311_v39 = vadd.f32 %v2516_v48, %v2454_v36  ;;  %v2689_v10 = vld [vmem:[#allocation40_spill] sm:$0xff] }
 0x167   : > { %1414 = vmatpush1.msra.mxu0 %v1388_v9  ;;  %1485 = vmatpush1.msra.mxu1 %v1390_v4  ;;  %v1381_v49 = vmax.f32 %v1317_v46, 0.0  ;;  %v1383_v13 = vmax.f32 %v1319_v16, 0.0  ;;  %v1308_v37 = vadd.f32 %v2516_v48, %v2445_v33  ;;  %v1310_v38 = vadd.f32 %v2516_v48, %v2448_v34  ;;  %v2690_v9 = vld [vmem:[#allocation37_spill] sm:$0xff] }
 0x168   : > { %1415 = vmatprep.subr.mxu0 %v1385_v24  ;;  %1486 = vmatprep.subr.mxu1 %v1387_v12  ;;  %v1380_v19 = vmax.f32 %v1316_v3, 0.0  ;;  %v1382_v40 = vmax.f32 %v1318_v57, 0.0  ;;  %v1305_v35 = vadd.f32 %v1234_v47, %v2439_v21  ;;  %v1307_v0 = vadd.f32 %v1234_v47, %v2442_v31 }
 0x169   : > { %1416 = vmatpush1.msra.mxu0 %v1384_v61  ;;  %1487 = vmatpush1.msra.mxu1 %v1386_v1  ;;  %v1377_v36 = vmax.f32 %v1313_v43, 0.0  ;;  %v1379_v25 = vmax.f32 %v1315_v63, 0.0  ;;  %v1304_v44 = vadd.f32 %v1234_v47, %v2433_v29  ;;  %v1306_v33 = vadd.f32 %v1234_v47, %v2436_v30  ;;  %v1214_v30 = vpop.permute.xlu0 %1213  ;;  %v2691_v43 = vld [vmem:[#allocation38_spill] sm:$0xff]  ;;  %v2693_v1 = vld [vmem:[#allocation36_spill] sm:$0xff] }
 0x16a   : > { %1417 = vmatprep.subr.mxu0 %v1381_v49  ;;  %1488 = vmatprep.subr.mxu1 %v1383_v13  ;;  %v1376_v45 = vmax.f32 %v1312_v41, 0.0  ;;  %v1378_v62 = vmax.f32 %v1314_v42, 0.0  ;;  %v1301_v34 = vadd.f32 %v1229_v51, %v2427_v27  ;;  %v1303_v48 = vadd.f32 %v1229_v51, %v2430_v28  ;;  %v2692_v42 = vld [vmem:[#allocation35_spill] sm:$0xff]  ;;  %v2694_v49 = vld [vmem:[#allocation33_spill] sm:$0xff] }
 0x16b   : > { %1418 = vmatpush1.msra.mxu0 %v1380_v19  ;;  %1489 = vmatpush1.msra.mxu1 %v1382_v40  ;;  %v1373_v5 = vmax.f32 %v1309_v60, 0.0  ;;  %v1375_v21 = vmax.f32 %v1311_v39, 0.0  ;;  %v1300_v31 = vadd.f32 %v1229_v51, %v2421_v50  ;;  %v1302_v17 = vadd.f32 %v1229_v51, %v2424_v54  ;;  %v1209_v54 = vpop.permute.xlu1 %1208 }
 0x16c   : > { %1419 = vmatprep.subr.mxu0 %v1377_v36  ;;  %1490 = vmatprep.subr.mxu1 %v1379_v25  ;;  %v1372_v55 = vmax.f32 %v1308_v37, 0.0  ;;  %v1374_v29 = vmax.f32 %v1310_v38, 0.0  ;;  %v1297_v2 = vadd.f32 %v1224_v11, %v2413_v58  ;;  %v1299_v59 = vadd.f32 %v1224_v11, %v2416_v18  ;;  %v2686_v18 = vld [vmem:[#allocation41_spill] sm:$0xff]  ;;  %v2695_v37 = vld [vmem:[#allocation34_spill] sm:$0xff]  ;;  %v2697_v36 = vld [vmem:[#allocation32_spill] sm:$0xff] }
 0x16d   : > { %1420 = vmatpush1.msra.mxu0 %v1376_v45  ;;  %1491 = vmatpush1.msra.mxu1 %v1378_v62  ;;  %v1369_v27 = vmax.f32 %v1305_v35, 0.0  ;;  %v1371_v20 = vmax.f32 %v1307_v0, 0.0  ;;  %v1296_v28 = vadd.f32 %v1224_v11, %v2407_v53  ;;  %v1298_v47 = vadd.f32 %v1224_v11, %v2410_v52  ;;  %v2688_v52 = vld [vmem:[#allocation39_spill] sm:$0xff]  ;;  %v1204_v41 = vpop.permute.xlu0 %1203  ;;  %v2698_v45 = vld [vmem:[#allocation29_spill] sm:$0xff] }
 0x16e   : > { %1421 = vmatprep.subr.mxu0 %v1373_v5  ;;  %1492 = vmatprep.subr.mxu1 %v1375_v21  ;;  %v1368_v50 = vmax.f32 %v1304_v44, 0.0  ;;  %v1370_v7 = vmax.f32 %v1306_v33, 0.0  ;;  %v1293_v56 = vadd.f32 %v1219_v23, %v2684_v6  ;;  %v1295_v15 = vadd.f32 %v1219_v23, %v2685_v32  ;;  %v2696_v35 = vld [vmem:[#allocation31_spill] sm:$0xff] }
 0x16f   : > { %1422 = vmatpush1.msra.mxu0 %v1372_v55  ;;  %1493 = vmatpush1.msra.mxu1 %v1374_v29  ;;  %v1365_v58 = vmax.f32 %v1301_v34, 0.0  ;;  %v1367_v26 = vmax.f32 %v1303_v48, 0.0  ;;  %v1292_v8 = vadd.f32 %v1219_v23, %v2686_v18  ;;  %v1294_v51 = vadd.f32 %v1219_v23, %v2687_v14  ;;  %v1199_v23 = vpop.permute.xlu1 %1198  ;;  %v2699_v34 = vld [vmem:[#allocation30_spill] sm:$0xff]  ;;  %v2701_v55 = vld [vmem:[#allocation28_spill] sm:$0xff]  ;;  %v1404_v18 = vld [vmem:[%s2603_s5] sm:$0x1] }
 0x170   : > { %1423 = vmatprep.subr.mxu0 %v1369_v27  ;;  %1494 = vmatprep.subr.mxu1 %v1371_v20  ;;  %v1364_v53 = vmax.f32 %v1300_v31, 0.0  ;;  %v1366_v46 = vmax.f32 %v1302_v17, 0.0  ;;  %v1289_v16 = vadd.f32 %v1214_v30, %v2688_v52  ;;  %v1291_v22 = vadd.f32 %v1214_v30, %v2689_v10  ;;  %v2700_v31 = vld [vmem:[#allocation27_spill] sm:$0xff]  ;;  %v2703_v20 = vld [vmem:[#allocation26_spill] sm:$0xff] }
 0x171   : > { %1424 = vmatpush1.msra.mxu0 %v1368_v50  ;;  %1495 = vmatpush1.msra.mxu1 %v1370_v7  ;;  %v1361_v3 = vmax.f32 %v1297_v2, 0.0  ;;  %v1363_v57 = vmax.f32 %v1299_v59, 0.0  ;;  %v1288_v4 = vadd.f32 %v1214_v30, %v2690_v9  ;;  %v1290_v63 = vadd.f32 %v1214_v30, %v2691_v43  ;;  %v2702_v59 = vld [vmem:[#allocation25_spill] sm:$0xff] }
 0x172   : > { %1425 = vmatprep.subr.mxu0 %v1365_v58  ;;  %1496 = vmatprep.subr.mxu1 %v1367_v26  ;;  %v1360_v24 = vmax.f32 %v1296_v28, 0.0  ;;  %v1362_v12 = vmax.f32 %v1298_v47, 0.0  ;;  %v1285_v61 = vadd.f32 %v1209_v54, %v2692_v42  ;;  %v1287_v11 = vadd.f32 %v1209_v54, %v2693_v1 }
 0x173   : > { %1426 = vmatpush1.msra.mxu0 %v1364_v53  ;;  %1497 = vmatpush1.msra.mxu1 %v1366_v46  ;;  %v1357_v60 = vmax.f32 %v1293_v56, 0.0  ;;  %v1359_v39 = vmax.f32 %v1295_v15, 0.0  ;;  %v1284_v13 = vadd.f32 %v1209_v54, %v2694_v49  ;;  %v1286_v38 = vadd.f32 %v1209_v54, %v2695_v37  ;;  %v2704_v37 = vld [vmem:[#allocation3_spill] sm:$0xff] }
 0x174   : > { %1427 = vmatprep.subr.mxu0 %v1361_v3  ;;  %1498 = vmatprep.subr.mxu1 %v1363_v57  ;;  %v1356_v19 = vmax.f32 %v1292_v8, 0.0  ;;  %v1358_v40 = vmax.f32 %v1294_v51, 0.0  ;;  %v1281_v0 = vadd.f32 %v1204_v41, %v2696_v35  ;;  %v1283_v25 = vadd.f32 %v1204_v41, %v2697_v36 }
 0x175   : > { %1428 = vmatpush1.msra.mxu0 %v1360_v24  ;;  %1499 = vmatpush1.msra.mxu1 %v1362_v12  ;;  %v1353_v44 = vmax.f32 %v1289_v16, 0.0  ;;  %v1355_v33 = vmax.f32 %v1291_v22, 0.0  ;;  %v1280_v62 = vadd.f32 %v1204_v41, %v2698_v45  ;;  %v1282_v48 = vadd.f32 %v1204_v41, %v2699_v34 }
 0x176   : > { %1429 = vmatprep.subr.mxu0 %v1357_v60  ;;  %1500 = vmatprep.subr.mxu1 %v1359_v39  ;;  %v1352_v5 = vmax.f32 %v1288_v4, 0.0  ;;  %v1354_v21 = vmax.f32 %v1290_v63, 0.0  ;;  %v1277_v17 = vadd.f32 %v1199_v23, %v2700_v31  ;;  %v1279_v29 = vadd.f32 %v1199_v23, %v2701_v55 }
 0x177   : > { %1430 = vmatpush1.msra.mxu0 %v1356_v19  ;;  %1501 = vmatpush1.msra.mxu1 %v1358_v40  ;;  %v1349_v30 = vmax.f32 %v1285_v61, 0.0  ;;  %v1351_v2 = vmax.f32 %v1287_v11, 0.0  ;;  %v1276_v27 = vadd.f32 %v1199_v23, %v2702_v59  ;;  %v1278_v28 = vadd.f32 %v1199_v23, %v2703_v20 }
 0x178   : > { %1431 = vmatprep.subr.mxu0 %v1353_v44  ;;  %1502 = vmatprep.subr.mxu1 %v1355_v33  ;;  %v1348_v47 = vmax.f32 %v1284_v13, 0.0  ;;  %v1350_v50 = vmax.f32 %v1286_v38, 0.0  ;;  %v1345_v7 = vmax.f32 %v1281_v0, 0.0  ;;  %v1347_v54 = vmax.f32 %v1283_v25, 0.0 }
 0x179   : > { %1432 = vmatpush1.msra.mxu0 %v1352_v5  ;;  %1503 = vmatpush1.msra.mxu1 %v1354_v21  ;;  %v1344_v6 = vmax.f32 %v1280_v62, 0.0  ;;  %v1346_v56 = vmax.f32 %v1282_v48, 0.0  ;;  %v1341_v32 = vmax.f32 %v1277_v17, 0.0  ;;  %v1343_v15 = vmax.f32 %v1279_v29, 0.0 }
 0x17a   : > { %1433 = vmatprep.subr.mxu0 %v1349_v30  ;;  %1504 = vmatprep.subr.mxu1 %v1351_v2  ;;  %v1340_v58 = vmax.f32 %v1276_v27, 0.0  ;;  %v1342_v26 = vmax.f32 %v1278_v28, 0.0  ;;  %v1406_v8 = vstv %s1405_s21  ;;  %v1830_v11 = vmov 1966171168  }
 0x17b   : > { %1434 = vmatpush1.msra.mxu0 %v1348_v47  ;;  %1505 = vmatpush1.msra.mxu1 %v1350_v50  ;;  %v1580_v60 = vunpack.c.l.s4 %v1830_v11  ;;  %v2705_v44 = vlaneseq }
 0x17c   : > { %1435 = vmatprep.subr.mxu0 %v1345_v7  ;;  %1506 = vmatprep.subr.mxu1 %v1347_v54 }
 0x17d   : > { %1436 = vmatpush1.msra.mxu0 %v1344_v6  ;;  %1507 = vmatpush1.msra.mxu1 %v1346_v56  ;;  %v1581_v39 = vunpack.c.0.s8 %v1580_v60  ;;  %vm1604_vm9 = vcmp.lt.s32.totalorder %v2705_v44, 512 }
 0x17e   : > { %1437 = vmatprep.subr.mxu0 %v1341_v32  ;;  %1508 = vmatprep.subr.mxu1 %v1343_v15 }
 0x17f   : > { %1438 = vmatpush1.msra.mxu0 %v1340_v58  ;;  %1509 = vmatpush1.msra.mxu1 %v1342_v26  ;;  %v1584_v38 = vsub.s32 %v1581_v39, %v2704_v37 }
 0x180   : > { %1472 = vmatmul.mubr.f32.vlgmr.msra.gmra.mxu0 %v1404_v18  ;;  %1543 = vmatmul.mubr.f32.vlgmr.msra.gmra.mxu1 %v1404_v18 }
 0x240   : > { %v1473_v14 = vpop.f32.mrf.mxu0  ;;  %v1544_v51 = vpop.f32.mrf.mxu1 }
 0x241   : > { %v1474_v53 = vadd.f32 %v1473_v14, %v1406_v8  ;;  %v1545_v46 = vadd.f32 %v1544_v51, %v1406_v8 }
 0x242   : > { %v1475_v52 = vpop.f32.mrf.mxu0  ;;  %v1546_v16 = vpop.f32.mrf.mxu1 }
 0x243   : > { %v1783_v10 = vmul.f32 -1.442695, %v1474_v53  ;;  %v1785_v22 = vmul.f32 -1.442695, %v1545_v46  ;;  %v1476_v3 = vadd.f32 %v1475_v52, %v1406_v8  ;;  %v1547_v57 = vadd.f32 %v1546_v16, %v1406_v8 }
 0x245   : > { %1803 = vpow2.f32 %v1783_v10  ;;  %v1784_v9 = vmul.f32 -1.442695, %v1476_v3  ;;  %v1786_v4 = vmul.f32 -1.442695, %v1547_v57 }
 0x246   : > { %1805 = vpow2.f32 %v1785_v22 }
 0x247   : > { %1807 = vpow2.f32 %v1784_v9 }
 0x248   : > { %1809 = vpow2.f32 %v1786_v4 }
 0x252   : > { %v1804_v43 = vpop.eup %1803 }
 0x253   : > { %v1806_v63 = vpop.eup %1805  ;;  %v1561_v24 = vadd.f32 1.0, %v1804_v43 }
 0x254   : > { %v1808_v12 = vpop.eup %1807  ;;  %v1563_v41 = vadd.f32 1.0, %v1806_v63 }
 0x255   : > { %v1810_v42 = vpop.eup %1809  ;;  %1811 = vrcp.f32 %v1561_v24  ;;  %v1562_v61 = vadd.f32 1.0, %v1808_v12 }
 0x256   : > { %1813 = vrcp.f32 %v1563_v41  ;;  %v1564_v1 = vadd.f32 1.0, %v1810_v42 }
 0x257   : > { %1815 = vrcp.f32 %v1562_v61 }
 0x258   : > { %1817 = vrcp.f32 %v1564_v1 }
 0x262   : > { %v1812_v49 = vpop.eup %1811 }
 0x263   : > { %v1814_v13 = vpop.eup %1813 }
 0x264   : > { %v1816_v19 = vpop.eup %1815 }
 0x265   : > { %v1818_v40 = vpop.eup %1817  ;;  %v1577_v23 = vcombine.low %v1812_v49, %v1816_v19 }
 0x266   : > { %v1578_v35 = vcombine.low %v1814_v13, %v1818_v40 }
 0x267   : > { %v1585_v0 = vrot.slane %v1577_v23, %v1584_v38 }
 0x268   : > { %v1592_v36 = vrot.slane %v1578_v35, %v1584_v38 }
 0x26a   : > { %v1593_v25 = vcombine.low %v1585_v0, %v1592_v36 }
 0x26c   : > { %v1600_v33 = vrot.slane %v1593_v25, %v1584_v38 }
 0x26e   : > { %1606 = vst.msk [vmem:[%s295_s24] sm:$0xf] %vm1604_vm9, %v1600_v33 }
 0x26f PF: > { %s18_s26 = sadd.s32 1, %s1825_s26  }
 0x270   : > { %p15_p4 = scmp.ge.s32.totalorder %s18_s26, 4  }
 0x272   :  { %17 = sbr.rel (!%p15_p4) target bundleno = 2 (0x2), region = 81 }

</bundles_post_ra>
